<compile_context>
chip_gen: v7x
topology: tpu7x:2x2x1
jax: 0.10.0
libtpu: 0.0.40
codegen_flags: <defaults>
</compile_context>

<pallas_src>
import functools

import jax
import jax.numpy as jnp
from jax.experimental import pallas as pl
from jax.experimental.pallas import tpu as pltpu

# ----------------------------- config -----------------------------
B = 2          # batch per branch
C = 3          # image channels
IMG = 16       # image height/width
PATCH = 8      # patch size
P = (IMG // PATCH) ** 2          # num patches per image = 4
DP = C * PATCH * PATCH           # patch dim = 192
D = 32                           # hidden size
NH = 2                           # attention heads
HD = D // NH                     # head dim = 16
MLP = 64                         # MLP hidden
SEQ = P + 1                      # tokens per image (CLS + patches) = 5
NTOK = B * SEQ                   # tokens per branch = 10
NPATCH = B * P                   # patch rows per branch = 8
LN_EPS = 1e-12                   # HF ViT default layer_norm_eps

# --------- packed small-parameter layout (one (SP_ROWS, SPW) array) ---------
SPW = 3 * D                      # 96 columns, covers D, 3D and MLP widths
R_BPE = 0                        # (1, D)
R_CLS = 1                        # (1, D)
R_POS = 2                        # (SEQ, D)  rows 2..6
R_LN1G = R_POS + SEQ             # 7
R_LN1B = R_LN1G + 1              # 8
R_BQKV = R_LN1B + 1              # 9   (1, 3D)
R_BO = R_BQKV + 1                # 10
R_LN2G = R_BO + 1                # 11
R_LN2B = R_LN2G + 1              # 12
R_B1 = R_LN2B + 1                # 13  (1, MLP)
R_B2 = R_B1 + 1                  # 14
R_LNFG = R_B2 + 1                # 15
R_LNFB = R_LNFG + 1              # 16
SP_ROWS = R_LNFB + 1             # 17


# ----------------------------- kernel -----------------------------
def _layer_norm(x, gamma, beta):
    mean = jnp.mean(x, axis=-1, keepdims=True)
    var = jnp.mean((x - mean) ** 2, axis=-1, keepdims=True)
    return (x - mean) * jax.lax.rsqrt(var + LN_EPS) * gamma + beta


def siamese_vit_kernel(
    patches_ref,                 # (1, B*P, DP)   one branch's patch rows
    wpe_ref,                     # (DP, D)
    wqkv_ref,                    # (D, 3D)        fused Q|K|V projection
    wo_ref,                      # (D, D)
    w1_ref,                      # (D, MLP)
    w2_ref,                      # (MLP, D)
    sp_ref,                      # (SP_ROWS, SPW) packed small params
    out_ref,                     # (1, B*SEQ, D)  last_hidden_state rows
):
    sp = sp_ref[...]
    bpe = sp[R_BPE:R_BPE + 1, :D]
    cls = sp[R_CLS:R_CLS + 1, :D]
    pos = sp[R_POS:R_POS + SEQ, :D]
    ln1g = sp[R_LN1G:R_LN1G + 1, :D]
    ln1b = sp[R_LN1B:R_LN1B + 1, :D]
    bqkv = sp[R_BQKV:R_BQKV + 1, :3 * D]
    bo = sp[R_BO:R_BO + 1, :D]
    ln2g = sp[R_LN2G:R_LN2G + 1, :D]
    ln2b = sp[R_LN2B:R_LN2B + 1, :D]
    b1 = sp[R_B1:R_B1 + 1, :MLP]
    b2 = sp[R_B2:R_B2 + 1, :D]
    lnfg = sp[R_LNFG:R_LNFG + 1, :D]
    lnfb = sp[R_LNFB:R_LNFB + 1, :D]

    # --- patch embedding for the whole branch batch: one (B*P, DP)x(DP, D) matmul ---
    pe = jnp.dot(patches_ref[0], wpe_ref[...],
                 preferred_element_type=jnp.float32) + bpe        # (B*P, D)

    # --- assemble tokens [CLS, patches] per image + positional embedding (in vregs) ---
    cls_row = cls + pos[0:1, :]                                   # (1, D)
    pos_patch = pos[1:SEQ, :]                                     # (P, D)
    rows = []
    for b in range(B):                                            # static unroll
        rows.append(cls_row)
        rows.append(pe[b * P:(b + 1) * P, :] + pos_patch)
    h = jnp.concatenate(rows, axis=0)                             # (NTOK, D)

    # --- pre-LN multi-head self-attention with fused QKV projection ---
    xn = _layer_norm(h, ln1g, ln1b)
    qkv = jnp.dot(xn, wqkv_ref[...],
                  preferred_element_type=jnp.float32) + bqkv      # (NTOK, 3D)

    scale = 1.0 / (HD ** 0.5)
    attn_rows = []
    for b in range(B):                                            # static unroll
        lo, hi = b * SEQ, (b + 1) * SEQ
        heads = []
        for hh in range(NH):                                      # static unroll
            qh = qkv[lo:hi, hh * HD:(hh + 1) * HD]
            kh = qkv[lo:hi, D + hh * HD:D + (hh + 1) * HD]
            vh = qkv[lo:hi, 2 * D + hh * HD:2 * D + (hh + 1) * HD]
            # q @ k^T via transposed-RHS contraction (no explicit transpose)
            s = jax.lax.dot_general(
                qh, kh, (((1,), (1,)), ((), ())),
                preferred_element_type=jnp.float32) * scale
            s = s - jnp.max(s, axis=-1, keepdims=True)
            p = jnp.exp(s)
            p = p / jnp.sum(p, axis=-1, keepdims=True)
            heads.append(jnp.dot(p, vh, preferred_element_type=jnp.float32))
        attn_rows.append(jnp.concatenate(heads, axis=-1))         # (SEQ, D)
    attn = jnp.concatenate(attn_rows, axis=0)                     # (NTOK, D)

    h = h + jnp.dot(attn, wo_ref[...],
                    preferred_element_type=jnp.float32) + bo

    # --- pre-LN MLP block ---
    xn2 = _layer_norm(h, ln2g, ln2b)
    hid = jnp.dot(xn2, w1_ref[...],
                  preferred_element_type=jnp.float32) + b1
    # TODO(synk): PyTorch nn.GELU / HF ViT default is the exact erf GELU; the tanh
    # approximation is used here for guaranteed Mosaic lowering (tiny numeric delta).
    hid = jax.nn.gelu(hid, approximate=True)
    h = h + jnp.dot(hid, w2_ref[...],
                    preferred_element_type=jnp.float32) + b2

    # --- final LayerNorm -> last_hidden_state, single full-block store ---
    out_ref[0] = _layer_norm(h, lnfg, lnfb)


# ----------------------------- wrapper -----------------------------
def _rep_spec(shape):
    """Full-array block, same (constant) block index every grid step -> one DMA."""
    n = len(shape)
    return pl.BlockSpec(shape, lambda g, _n=n: (0,) * _n)


def _extract_patches(x):
    """NCHW -> (B*P, C*ph*pw), matching Conv2d(stride=patch) flattening order."""
    b, c, hh, ww = x.shape
    gh, gw = hh // PATCH, ww // PATCH
    x = x.reshape(b, c, gh, PATCH, gw, PATCH)
    x = x.transpose(0, 2, 4, 1, 3, 5)              # (B, gh, gw, C, ph, pw)
    return x.reshape(b * gh * gw, c * PATCH * PATCH)


def _pad_row(v):
    v = jnp.asarray(v, jnp.float32)
    v = v.reshape(-1, v.shape[-1])
    return jnp.pad(v, ((0, 0), (0, SPW - v.shape[-1])))


def _pack_small_params(p):
    bqkv = jnp.concatenate([p["bq"], p["bk"], p["bv"]], axis=-1)   # (1, 3D)
    rows = [
        _pad_row(p["bpe"]), _pad_row(p["cls"]), _pad_row(p["pos"]),
        _pad_row(p["ln1g"]), _pad_row(p["ln1b"]),
        _pad_row(bqkv), _pad_row(p["bo"]),
        _pad_row(p["ln2g"]), _pad_row(p["ln2b"]),
        _pad_row(p["b1"]), _pad_row(p["b2"]),
        _pad_row(p["lnfg"]), _pad_row(p["lnfb"]),
    ]
    sp = jnp.concatenate(rows, axis=0)
    assert sp.shape == (SP_ROWS, SPW)
    return sp


def _run_fused(params, patches_stacked):
    """patches_stacked: (2, B*P, DP) -> (2, B, SEQ, D) last hidden states."""
    wqkv = jnp.concatenate([params["wq"], params["wk"], params["wv"]], axis=-1)
    sp = _pack_small_params(params)
    weights = [params["wpe"], wqkv, params["wo"], params["w1"], params["w2"], sp]

    in_specs = [pl.BlockSpec((1, NPATCH, DP), lambda g: (g, 0, 0))]
    in_specs += [_rep_spec(w.shape) for w in weights]

    out = pl.pallas_call(
        siamese_vit_kernel,
        out_shape=jax.ShapeDtypeStruct((2, NTOK, D), jnp.float32),
        grid=(2,),                                     # one step per branch
        in_specs=in_specs,
        out_specs=pl.BlockSpec((1, NTOK, D), lambda g: (g, 0, 0)),
        compiler_params=pltpu.CompilerParams(
            dimension_semantics=("parallel",)),        # v7x: 1 branch per TensorCore
    )(patches_stacked, *weights)

    return out.reshape(2, B, SEQ, D)


@jax.jit
def _siamese_jit(params, x1, x2):
    patches = jnp.stack([_extract_patches(x1), _extract_patches(x2)], axis=0)
    out = _run_fused(params, patches)
    return out[0], out[1]


PARAM_ORDER = [
    "wpe", "bpe", "cls", "pos",
    "ln1g", "ln1b", "wq", "bq", "wk", "bk", "wv", "bv", "wo", "bo",
    "ln2g", "ln2b", "w1", "b1", "w2", "b2", "lnfg", "lnfb",
]


def make_encoder_params(key):
    shapes = {
        "wpe": (DP, D), "bpe": (1, D), "cls": (1, D), "pos": (SEQ, D),
        "ln1g": (1, D), "ln1b": (1, D),
        "wq": (D, D), "bq": (1, D), "wk": (D, D), "bk": (1, D),
        "wv": (D, D), "bv": (1, D), "wo": (D, D), "bo": (1, D),
        "ln2g": (1, D), "ln2b": (1, D),
        "w1": (D, MLP), "b1": (1, MLP), "w2": (MLP, D), "b2": (1, D),
        "lnfg": (1, D), "lnfb": (1, D),
    }
    params = {}
    keys = jax.random.split(key, len(PARAM_ORDER))
    for k, name in zip(keys, PARAM_ORDER):
        shp = shapes[name]
        if name in ("ln1g", "ln2g", "lnfg"):
            params[name] = jnp.ones(shp, jnp.float32)
        elif name in ("ln1b", "ln2b", "lnfb", "bpe", "bq", "bk", "bv",
                      "bo", "b1", "b2"):
            params[name] = jnp.zeros(shp, jnp.float32)
        else:
            params[name] = 0.02 * jax.random.normal(k, shp, jnp.float32)
    return params


class SiameseNetwork:
    """JAX/Pallas port of the PyTorch SiameseNetwork module."""

    def __init__(self, params):
        self.params = params

    def forward_one(self, x):
        # Single branch: reuse the fused two-branch kernel (one pallas_call).
        patches = _extract_patches(x)
        out = _run_fused(self.params, jnp.stack([patches, patches], axis=0))
        return out[0]

    def forward(self, x1, x2):
        print(f'forward input shapes: {x1.shape}, {x2.shape}')
        return _siamese_jit(self.params, x1, x2)

    __call__ = forward


# ----------------------------- main -----------------------------
if __name__ == "__main__":
    key = jax.random.PRNGKey(0)
    kp, k1, k2 = jax.random.split(key, 3)

    params = make_encoder_params(kp)
    x1 = jax.random.normal(k1, (B, C, IMG, IMG), jnp.float32)
    x2 = jax.random.normal(k2, (B, C, IMG, IMG), jnp.float32)

    net = SiameseNetwork(params)
    out1, out2 = net(x1, x2)
    jax.block_until_ready((out1, out2))

    assert out1.shape == (B, SEQ, D) and out2.shape == (B, SEQ, D)
    assert out1.dtype == jnp.float32 and out2.dtype == jnp.float32
    assert bool(jnp.all(jnp.isfinite(out1))) and bool(jnp.all(jnp.isfinite(out2)))
    print("KERNEL_OK")
</pallas_src>

<mosaic_0001>
module attributes {stable_mosaic.version = 11 : i64} {
  func.func @siamese_vit_kernel(%arg0: i32, %arg1: memref<1x8x192xf32, #tpu.memory_space<vmem>>, %arg2: memref<192x32xf32, #tpu.memory_space<vmem>>, %arg3: memref<32x96xf32, #tpu.memory_space<vmem>>, %arg4: memref<32x32xf32, #tpu.memory_space<vmem>>, %arg5: memref<32x64xf32, #tpu.memory_space<vmem>>, %arg6: memref<64x32xf32, #tpu.memory_space<vmem>>, %arg7: memref<17x96xf32, #tpu.memory_space<vmem>>, %arg8: memref<1x10x32xf32, #tpu.memory_space<vmem>>) attributes {dimension_semantics = [#tpu.dimension_semantics<parallel>], iteration_bounds = array<i64: 2>, scalar_prefetch = 0 : i64, scratch_operands = 0 : i64, tpu.core_type = #tpu.core_type<tc>, window_params = [{transform_indices = @transform_0, window_bounds = array<i64: 1, 8, 192>}, {pipeline_mode = #tpu.pipeline_mode<synchronous>, transform_indices = @transform_1, window_bounds = array<i64: 192, 32>}, {pipeline_mode = #tpu.pipeline_mode<synchronous>, transform_indices = @transform_2, window_bounds = array<i64: 32, 96>}, {pipeline_mode = #tpu.pipeline_mode<synchronous>, transform_indices = @transform_3, window_bounds = array<i64: 32, 32>}, {pipeline_mode = #tpu.pipeline_mode<synchronous>, transform_indices = @transform_4, window_bounds = array<i64: 32, 64>}, {pipeline_mode = #tpu.pipeline_mode<synchronous>, transform_indices = @transform_5, window_bounds = array<i64: 64, 32>}, {pipeline_mode = #tpu.pipeline_mode<synchronous>, transform_indices = @transform_6, window_bounds = array<i64: 17, 96>}, {transform_indices = @transform_7, window_bounds = array<i64: 1, 10, 32>}]} {
    %c0 = arith.constant 0 : index
    %c0_0 = arith.constant 0 : index
    %0 = vector.load %arg7[%c0, %c0_0] : memref<17x96xf32, #tpu.memory_space<vmem>>, vector<17x96xf32>
    %1 = vector.extract_strided_slice %0 {offsets = [0, 0], sizes = [1, 32], strides = [1, 1]} : vector<17x96xf32> to vector<1x32xf32>
    %2 = vector.extract_strided_slice %0 {offsets = [1, 0], sizes = [1, 32], strides = [1, 1]} : vector<17x96xf32> to vector<1x32xf32>
    %3 = vector.extract_strided_slice %0 {offsets = [2, 0], sizes = [5, 32], strides = [1, 1]} : vector<17x96xf32> to vector<5x32xf32>
    %4 = vector.extract_strided_slice %0 {offsets = [7, 0], sizes = [1, 32], strides = [1, 1]} : vector<17x96xf32> to vector<1x32xf32>
    %5 = vector.extract_strided_slice %0 {offsets = [8, 0], sizes = [1, 32], strides = [1, 1]} : vector<17x96xf32> to vector<1x32xf32>
    %6 = vector.extract_strided_slice %0 {offsets = [9, 0], sizes = [1, 96], strides = [1, 1]} : vector<17x96xf32> to vector<1x96xf32>
    %7 = vector.extract_strided_slice %0 {offsets = [10, 0], sizes = [1, 32], strides = [1, 1]} : vector<17x96xf32> to vector<1x32xf32>
    %8 = vector.extract_strided_slice %0 {offsets = [11, 0], sizes = [1, 32], strides = [1, 1]} : vector<17x96xf32> to vector<1x32xf32>
    %9 = vector.extract_strided_slice %0 {offsets = [12, 0], sizes = [1, 32], strides = [1, 1]} : vector<17x96xf32> to vector<1x32xf32>
    %10 = vector.extract_strided_slice %0 {offsets = [13, 0], sizes = [1, 64], strides = [1, 1]} : vector<17x96xf32> to vector<1x64xf32>
    %11 = vector.extract_strided_slice %0 {offsets = [14, 0], sizes = [1, 32], strides = [1, 1]} : vector<17x96xf32> to vector<1x32xf32>
    %12 = vector.extract_strided_slice %0 {offsets = [15, 0], sizes = [1, 32], strides = [1, 1]} : vector<17x96xf32> to vector<1x32xf32>
    %13 = vector.extract_strided_slice %0 {offsets = [16, 0], sizes = [1, 32], strides = [1, 1]} : vector<17x96xf32> to vector<1x32xf32>
    %c0_1 = arith.constant 0 : index
    %c0_2 = arith.constant 0 : index
    %c0_3 = arith.constant 0 : index
    %14 = vector.load %arg1[%c0_1, %c0_2, %c0_3] : memref<1x8x192xf32, #tpu.memory_space<vmem>>, vector<1x8x192xf32>
    %15 = vector.shape_cast %14 : vector<1x8x192xf32> to vector<8x192xf32>
    %c0_4 = arith.constant 0 : index
    %c0_5 = arith.constant 0 : index
    %16 = vector.load %arg2[%c0_4, %c0_5] : memref<192x32xf32, #tpu.memory_space<vmem>>, vector<192x32xf32>
    %cst = arith.constant dense<0.000000e+00> : vector<8x32xf32>
    %17 = tpu.matmul %15, %16, %cst {dimension_numbers = #tpu.dot_dimension_numbers<[1], [0], [0], [1], [0, 0, 1, 1], [], []>} : vector<8x192xf32>, vector<192x32xf32>, vector<8x32xf32> -> vector<8x32xf32>
    %18 = vector.broadcast %1 : vector<1x32xf32> to vector<8x32xf32>
    %19 = arith.addf %17, %18 : vector<8x32xf32>
    %20 = vector.extract_strided_slice %3 {offsets = [0, 0], sizes = [1, 32], strides = [1, 1]} : vector<5x32xf32> to vector<1x32xf32>
    %21 = arith.addf %2, %20 : vector<1x32xf32>
    %22 = vector.extract_strided_slice %3 {offsets = [1, 0], sizes = [4, 32], strides = [1, 1]} : vector<5x32xf32> to vector<4x32xf32>
    %23 = vector.extract_strided_slice %19 {offsets = [0, 0], sizes = [4, 32], strides = [1, 1]} : vector<8x32xf32> to vector<4x32xf32>
    %24 = arith.addf %23, %22 : vector<4x32xf32>
    %25 = vector.extract_strided_slice %19 {offsets = [4, 0], sizes = [4, 32], strides = [1, 1]} : vector<8x32xf32> to vector<4x32xf32>
    %26 = arith.addf %25, %22 : vector<4x32xf32>
    %27 = tpu.concatenate %21, %24, %21, %26 in 0 : vector<1x32xf32>, vector<4x32xf32>, vector<1x32xf32>, vector<4x32xf32> -> vector<10x32xf32>
    %cst_6 = arith.constant dense<0.000000e+00> : vector<10xf32>
    %28 = vector.multi_reduction <add>, %27, %cst_6 [1] : vector<10x32xf32> to vector<10xf32>
    %29 = vector.shape_cast %28 : vector<10xf32> to vector<10x1xf32>
    %cst_7 = arith.constant 3.200000e+01 : f32
    %30 = vector.broadcast %cst_7 : f32 to vector<10x1xf32>
    %31 = arith.divf %29, %30 : vector<10x1xf32>
    %32 = vector.broadcast %31 : vector<10x1xf32> to vector<10x32xf32>
    %33 = arith.subf %27, %32 : vector<10x32xf32>
    %34 = arith.mulf %33, %33 : vector<10x32xf32>
    %cst_8 = arith.constant dense<0.000000e+00> : vector<10xf32>
    %35 = vector.multi_reduction <add>, %34, %cst_8 [1] : vector<10x32xf32> to vector<10xf32>
    %36 = vector.shape_cast %35 : vector<10xf32> to vector<10x1xf32>
    %cst_9 = arith.constant 3.200000e+01 : f32
    %37 = vector.broadcast %cst_9 : f32 to vector<10x1xf32>
    %38 = arith.divf %36, %37 : vector<10x1xf32>
    %39 = vector.broadcast %31 : vector<10x1xf32> to vector<10x32xf32>
    %40 = arith.subf %27, %39 : vector<10x32xf32>
    %cst_10 = arith.constant 9.99999996E-13 : f32
    %41 = vector.broadcast %cst_10 : f32 to vector<10x1xf32>
    %42 = arith.addf %38, %41 : vector<10x1xf32>
    %43 = math.rsqrt %42 : vector<10x1xf32>
    %44 = vector.broadcast %43 : vector<10x1xf32> to vector<10x32xf32>
    %45 = arith.mulf %40, %44 : vector<10x32xf32>
    %46 = vector.broadcast %4 : vector<1x32xf32> to vector<10x32xf32>
    %47 = arith.mulf %45, %46 : vector<10x32xf32>
    %48 = vector.broadcast %5 : vector<1x32xf32> to vector<10x32xf32>
    %49 = arith.addf %47, %48 : vector<10x32xf32>
    %c0_11 = arith.constant 0 : index
    %c0_12 = arith.constant 0 : index
    %50 = vector.load %arg3[%c0_11, %c0_12] : memref<32x96xf32, #tpu.memory_space<vmem>>, vector<32x96xf32>
    %cst_13 = arith.constant dense<0.000000e+00> : vector<10x96xf32>
    %51 = tpu.matmul %49, %50, %cst_13 {dimension_numbers = #tpu.dot_dimension_numbers<[1], [0], [0], [1], [0, 0, 1, 1], [], []>} : vector<10x32xf32>, vector<32x96xf32>, vector<10x96xf32> -> vector<10x96xf32>
    %52 = vector.broadcast %6 : vector<1x96xf32> to vector<10x96xf32>
    %53 = arith.addf %51, %52 : vector<10x96xf32>
    %54 = vector.extract_strided_slice %53 {offsets = [0, 0], sizes = [5, 16], strides = [1, 1]} : vector<10x96xf32> to vector<5x16xf32>
    %55 = vector.extract_strided_slice %53 {offsets = [0, 32], sizes = [5, 16], strides = [1, 1]} : vector<10x96xf32> to vector<5x16xf32>
    %56 = vector.extract_strided_slice %53 {offsets = [0, 64], sizes = [5, 16], strides = [1, 1]} : vector<10x96xf32> to vector<5x16xf32>
    %cst_14 = arith.constant dense<0.000000e+00> : vector<5x5xf32>
    %57 = tpu.matmul %54, %55, %cst_14 {dimension_numbers = #tpu.dot_dimension_numbers<[1], [1], [0], [0], [0, 0, 1, 0], [], []>} : vector<5x16xf32>, vector<5x16xf32>, vector<5x5xf32> -> vector<5x5xf32>
    %cst_15 = arith.constant 2.500000e-01 : f32
    %58 = vector.broadcast %cst_15 : f32 to vector<5x5xf32>
    %59 = arith.mulf %57, %58 : vector<5x5xf32>
    %cst_16 = arith.constant dense<0xFF800000> : vector<5xf32>
    %60 = vector.multi_reduction <maximumf>, %59, %cst_16 [1] : vector<5x5xf32> to vector<5xf32>
    %61 = vector.shape_cast %60 : vector<5xf32> to vector<5x1xf32>
    %62 = vector.broadcast %61 : vector<5x1xf32> to vector<5x5xf32>
    %63 = arith.subf %59, %62 : vector<5x5xf32>
    %64 = math.exp %63 : vector<5x5xf32>
    %cst_17 = arith.constant dense<0.000000e+00> : vector<5xf32>
    %65 = vector.multi_reduction <add>, %64, %cst_17 [1] : vector<5x5xf32> to vector<5xf32>
    %66 = vector.shape_cast %65 : vector<5xf32> to vector<5x1xf32>
    %67 = vector.broadcast %66 : vector<5x1xf32> to vector<5x5xf32>
    %68 = arith.divf %64, %67 : vector<5x5xf32>
    %cst_18 = arith.constant dense<0.000000e+00> : vector<5x16xf32>
    %69 = tpu.matmul %68, %56, %cst_18 {dimension_numbers = #tpu.dot_dimension_numbers<[1], [0], [0], [1], [0, 0, 1, 1], [], []>} : vector<5x5xf32>, vector<5x16xf32>, vector<5x16xf32> -> vector<5x16xf32>
    %70 = vector.extract_strided_slice %53 {offsets = [0, 16], sizes = [5, 16], strides = [1, 1]} : vector<10x96xf32> to vector<5x16xf32>
    %71 = vector.extract_strided_slice %53 {offsets = [0, 48], sizes = [5, 16], strides = [1, 1]} : vector<10x96xf32> to vector<5x16xf32>
    %72 = vector.extract_strided_slice %53 {offsets = [0, 80], sizes = [5, 16], strides = [1, 1]} : vector<10x96xf32> to vector<5x16xf32>
    %cst_19 = arith.constant dense<0.000000e+00> : vector<5x5xf32>
    %73 = tpu.matmul %70, %71, %cst_19 {dimension_numbers = #tpu.dot_dimension_numbers<[1], [1], [0], [0], [0, 0, 1, 0], [], []>} : vector<5x16xf32>, vector<5x16xf32>, vector<5x5xf32> -> vector<5x5xf32>
    %cst_20 = arith.constant 2.500000e-01 : f32
    %74 = vector.broadcast %cst_20 : f32 to vector<5x5xf32>
    %75 = arith.mulf %73, %74 : vector<5x5xf32>
    %cst_21 = arith.constant dense<0xFF800000> : vector<5xf32>
    %76 = vector.multi_reduction <maximumf>, %75, %cst_21 [1] : vector<5x5xf32> to vector<5xf32>
    %77 = vector.shape_cast %76 : vector<5xf32> to vector<5x1xf32>
    %78 = vector.broadcast %77 : vector<5x1xf32> to vector<5x5xf32>
    %79 = arith.subf %75, %78 : vector<5x5xf32>
    %80 = math.exp %79 : vector<5x5xf32>
    %cst_22 = arith.constant dense<0.000000e+00> : vector<5xf32>
    %81 = vector.multi_reduction <add>, %80, %cst_22 [1] : vector<5x5xf32> to vector<5xf32>
    %82 = vector.shape_cast %81 : vector<5xf32> to vector<5x1xf32>
    %83 = vector.broadcast %82 : vector<5x1xf32> to vector<5x5xf32>
    %84 = arith.divf %80, %83 : vector<5x5xf32>
    %cst_23 = arith.constant dense<0.000000e+00> : vector<5x16xf32>
    %85 = tpu.matmul %84, %72, %cst_23 {dimension_numbers = #tpu.dot_dimension_numbers<[1], [0], [0], [1], [0, 0, 1, 1], [], []>} : vector<5x5xf32>, vector<5x16xf32>, vector<5x16xf32> -> vector<5x16xf32>
    %86 = tpu.concatenate %69, %85 in 1 : vector<5x16xf32>, vector<5x16xf32> -> vector<5x32xf32>
    %87 = vector.extract_strided_slice %53 {offsets = [5, 0], sizes = [5, 16], strides = [1, 1]} : vector<10x96xf32> to vector<5x16xf32>
    %88 = vector.extract_strided_slice %53 {offsets = [5, 32], sizes = [5, 16], strides = [1, 1]} : vector<10x96xf32> to vector<5x16xf32>
    %89 = vector.extract_strided_slice %53 {offsets = [5, 64], sizes = [5, 16], strides = [1, 1]} : vector<10x96xf32> to vector<5x16xf32>
    %cst_24 = arith.constant dense<0.000000e+00> : vector<5x5xf32>
    %90 = tpu.matmul %87, %88, %cst_24 {dimension_numbers = #tpu.dot_dimension_numbers<[1], [1], [0], [0], [0, 0, 1, 0], [], []>} : vector<5x16xf32>, vector<5x16xf32>, vector<5x5xf32> -> vector<5x5xf32>
    %cst_25 = arith.constant 2.500000e-01 : f32
    %91 = vector.broadcast %cst_25 : f32 to vector<5x5xf32>
    %92 = arith.mulf %90, %91 : vector<5x5xf32>
    %cst_26 = arith.constant dense<0xFF800000> : vector<5xf32>
    %93 = vector.multi_reduction <maximumf>, %92, %cst_26 [1] : vector<5x5xf32> to vector<5xf32>
    %94 = vector.shape_cast %93 : vector<5xf32> to vector<5x1xf32>
    %95 = vector.broadcast %94 : vector<5x1xf32> to vector<5x5xf32>
    %96 = arith.subf %92, %95 : vector<5x5xf32>
    %97 = math.exp %96 : vector<5x5xf32>
    %cst_27 = arith.constant dense<0.000000e+00> : vector<5xf32>
    %98 = vector.multi_reduction <add>, %97, %cst_27 [1] : vector<5x5xf32> to vector<5xf32>
    %99 = vector.shape_cast %98 : vector<5xf32> to vector<5x1xf32>
    %100 = vector.broadcast %99 : vector<5x1xf32> to vector<5x5xf32>
    %101 = arith.divf %97, %100 : vector<5x5xf32>
    %cst_28 = arith.constant dense<0.000000e+00> : vector<5x16xf32>
    %102 = tpu.matmul %101, %89, %cst_28 {dimension_numbers = #tpu.dot_dimension_numbers<[1], [0], [0], [1], [0, 0, 1, 1], [], []>} : vector<5x5xf32>, vector<5x16xf32>, vector<5x16xf32> -> vector<5x16xf32>
    %103 = vector.extract_strided_slice %53 {offsets = [5, 16], sizes = [5, 16], strides = [1, 1]} : vector<10x96xf32> to vector<5x16xf32>
    %104 = vector.extract_strided_slice %53 {offsets = [5, 48], sizes = [5, 16], strides = [1, 1]} : vector<10x96xf32> to vector<5x16xf32>
    %105 = vector.extract_strided_slice %53 {offsets = [5, 80], sizes = [5, 16], strides = [1, 1]} : vector<10x96xf32> to vector<5x16xf32>
    %cst_29 = arith.constant dense<0.000000e+00> : vector<5x5xf32>
    %106 = tpu.matmul %103, %104, %cst_29 {dimension_numbers = #tpu.dot_dimension_numbers<[1], [1], [0], [0], [0, 0, 1, 0], [], []>} : vector<5x16xf32>, vector<5x16xf32>, vector<5x5xf32> -> vector<5x5xf32>
    %cst_30 = arith.constant 2.500000e-01 : f32
    %107 = vector.broadcast %cst_30 : f32 to vector<5x5xf32>
    %108 = arith.mulf %106, %107 : vector<5x5xf32>
    %cst_31 = arith.constant dense<0xFF800000> : vector<5xf32>
    %109 = vector.multi_reduction <maximumf>, %108, %cst_31 [1] : vector<5x5xf32> to vector<5xf32>
    %110 = vector.shape_cast %109 : vector<5xf32> to vector<5x1xf32>
    %111 = vector.broadcast %110 : vector<5x1xf32> to vector<5x5xf32>
    %112 = arith.subf %108, %111 : vector<5x5xf32>
    %113 = math.exp %112 : vector<5x5xf32>
    %cst_32 = arith.constant dense<0.000000e+00> : vector<5xf32>
    %114 = vector.multi_reduction <add>, %113, %cst_32 [1] : vector<5x5xf32> to vector<5xf32>
    %115 = vector.shape_cast %114 : vector<5xf32> to vector<5x1xf32>
    %116 = vector.broadcast %115 : vector<5x1xf32> to vector<5x5xf32>
    %117 = arith.divf %113, %116 : vector<5x5xf32>
    %cst_33 = arith.constant dense<0.000000e+00> : vector<5x16xf32>
    %118 = tpu.matmul %117, %105, %cst_33 {dimension_numbers = #tpu.dot_dimension_numbers<[1], [0], [0], [1], [0, 0, 1, 1], [], []>} : vector<5x5xf32>, vector<5x16xf32>, vector<5x16xf32> -> vector<5x16xf32>
    %119 = tpu.concatenate %102, %118 in 1 : vector<5x16xf32>, vector<5x16xf32> -> vector<5x32xf32>
    %120 = tpu.concatenate %86, %119 in 0 : vector<5x32xf32>, vector<5x32xf32> -> vector<10x32xf32>
    %c0_34 = arith.constant 0 : index
    %c0_35 = arith.constant 0 : index
    %121 = vector.load %arg4[%c0_34, %c0_35] : memref<32x32xf32, #tpu.memory_space<vmem>>, vector<32x32xf32>
    %cst_36 = arith.constant dense<0.000000e+00> : vector<10x32xf32>
    %122 = tpu.matmul %120, %121, %cst_36 {dimension_numbers = #tpu.dot_dimension_numbers<[1], [0], [0], [1], [0, 0, 1, 1], [], []>} : vector<10x32xf32>, vector<32x32xf32>, vector<10x32xf32> -> vector<10x32xf32>
    %123 = arith.addf %27, %122 : vector<10x32xf32>
    %124 = vector.broadcast %7 : vector<1x32xf32> to vector<10x32xf32>
    %125 = arith.addf %123, %124 : vector<10x32xf32>
    %cst_37 = arith.constant dense<0.000000e+00> : vector<10xf32>
    %126 = vector.multi_reduction <add>, %125, %cst_37 [1] : vector<10x32xf32> to vector<10xf32>
    %127 = vector.shape_cast %126 : vector<10xf32> to vector<10x1xf32>
    %cst_38 = arith.constant 3.200000e+01 : f32
    %128 = vector.broadcast %cst_38 : f32 to vector<10x1xf32>
    %129 = arith.divf %127, %128 : vector<10x1xf32>
    %130 = vector.broadcast %129 : vector<10x1xf32> to vector<10x32xf32>
    %131 = arith.subf %125, %130 : vector<10x32xf32>
    %132 = arith.mulf %131, %131 : vector<10x32xf32>
    %cst_39 = arith.constant dense<0.000000e+00> : vector<10xf32>
    %133 = vector.multi_reduction <add>, %132, %cst_39 [1] : vector<10x32xf32> to vector<10xf32>
    %134 = vector.shape_cast %133 : vector<10xf32> to vector<10x1xf32>
    %cst_40 = arith.constant 3.200000e+01 : f32
    %135 = vector.broadcast %cst_40 : f32 to vector<10x1xf32>
    %136 = arith.divf %134, %135 : vector<10x1xf32>
    %137 = vector.broadcast %129 : vector<10x1xf32> to vector<10x32xf32>
    %138 = arith.subf %125, %137 : vector<10x32xf32>
    %cst_41 = arith.constant 9.99999996E-13 : f32
    %139 = vector.broadcast %cst_41 : f32 to vector<10x1xf32>
    %140 = arith.addf %136, %139 : vector<10x1xf32>
    %141 = math.rsqrt %140 : vector<10x1xf32>
    %142 = vector.broadcast %141 : vector<10x1xf32> to vector<10x32xf32>
    %143 = arith.mulf %138, %142 : vector<10x32xf32>
    %144 = vector.broadcast %8 : vector<1x32xf32> to vector<10x32xf32>
    %145 = arith.mulf %143, %144 : vector<10x32xf32>
    %146 = vector.broadcast %9 : vector<1x32xf32> to vector<10x32xf32>
    %147 = arith.addf %145, %146 : vector<10x32xf32>
    %c0_42 = arith.constant 0 : index
    %c0_43 = arith.constant 0 : index
    %148 = vector.load %arg5[%c0_42, %c0_43] : memref<32x64xf32, #tpu.memory_space<vmem>>, vector<32x64xf32>
    %cst_44 = arith.constant dense<0.000000e+00> : vector<10x64xf32>
    %149 = tpu.matmul %147, %148, %cst_44 {dimension_numbers = #tpu.dot_dimension_numbers<[1], [0], [0], [1], [0, 0, 1, 1], [], []>} : vector<10x32xf32>, vector<32x64xf32>, vector<10x64xf32> -> vector<10x64xf32>
    %150 = vector.broadcast %10 : vector<1x64xf32> to vector<10x64xf32>
    %151 = arith.addf %149, %150 : vector<10x64xf32>
    %152 = arith.mulf %151, %151 : vector<10x64xf32>
    %153 = arith.mulf %151, %152 : vector<10x64xf32>
    %cst_45 = arith.constant 4.471500e-02 : f32
    %154 = vector.broadcast %cst_45 : f32 to vector<10x64xf32>
    %155 = arith.mulf %154, %153 : vector<10x64xf32>
    %156 = arith.addf %151, %155 : vector<10x64xf32>
    %cst_46 = arith.constant 0.797884583 : f32
    %157 = vector.broadcast %cst_46 : f32 to vector<10x64xf32>
    %158 = arith.mulf %157, %156 : vector<10x64xf32>
    %159 = math.tanh %158 : vector<10x64xf32>
    %cst_47 = arith.constant 1.000000e+00 : f32
    %160 = vector.broadcast %cst_47 : f32 to vector<10x64xf32>
    %161 = arith.addf %160, %159 : vector<10x64xf32>
    %cst_48 = arith.constant 5.000000e-01 : f32
    %162 = vector.broadcast %cst_48 : f32 to vector<10x64xf32>
    %163 = arith.mulf %162, %161 : vector<10x64xf32>
    %164 = arith.mulf %151, %163 : vector<10x64xf32>
    %c0_49 = arith.constant 0 : index
    %c0_50 = arith.constant 0 : index
    %165 = vector.load %arg6[%c0_49, %c0_50] : memref<64x32xf32, #tpu.memory_space<vmem>>, vector<64x32xf32>
    %cst_51 = arith.constant dense<0.000000e+00> : vector<10x32xf32>
    %166 = tpu.matmul %164, %165, %cst_51 {dimension_numbers = #tpu.dot_dimension_numbers<[1], [0], [0], [1], [0, 0, 1, 1], [], []>} : vector<10x64xf32>, vector<64x32xf32>, vector<10x32xf32> -> vector<10x32xf32>
    %167 = arith.addf %125, %166 : vector<10x32xf32>
    %168 = vector.broadcast %11 : vector<1x32xf32> to vector<10x32xf32>
    %169 = arith.addf %167, %168 : vector<10x32xf32>
    %cst_52 = arith.constant dense<0.000000e+00> : vector<10xf32>
    %170 = vector.multi_reduction <add>, %169, %cst_52 [1] : vector<10x32xf32> to vector<10xf32>
    %171 = vector.shape_cast %170 : vector<10xf32> to vector<10x1xf32>
    %cst_53 = arith.constant 3.200000e+01 : f32
    %172 = vector.broadcast %cst_53 : f32 to vector<10x1xf32>
    %173 = arith.divf %171, %172 : vector<10x1xf32>
    %174 = vector.broadcast %173 : vector<10x1xf32> to vector<10x32xf32>
    %175 = arith.subf %169, %174 : vector<10x32xf32>
    %176 = arith.mulf %175, %175 : vector<10x32xf32>
    %cst_54 = arith.constant dense<0.000000e+00> : vector<10xf32>
    %177 = vector.multi_reduction <add>, %176, %cst_54 [1] : vector<10x32xf32> to vector<10xf32>
    %178 = vector.shape_cast %177 : vector<10xf32> to vector<10x1xf32>
    %cst_55 = arith.constant 3.200000e+01 : f32
    %179 = vector.broadcast %cst_55 : f32 to vector<10x1xf32>
    %180 = arith.divf %178, %179 : vector<10x1xf32>
    %181 = vector.broadcast %173 : vector<10x1xf32> to vector<10x32xf32>
    %182 = arith.subf %169, %181 : vector<10x32xf32>
    %cst_56 = arith.constant 9.99999996E-13 : f32
    %183 = vector.broadcast %cst_56 : f32 to vector<10x1xf32>
    %184 = arith.addf %180, %183 : vector<10x1xf32>
    %185 = math.rsqrt %184 : vector<10x1xf32>
    %186 = vector.broadcast %185 : vector<10x1xf32> to vector<10x32xf32>
    %187 = arith.mulf %182, %186 : vector<10x32xf32>
    %188 = vector.broadcast %12 : vector<1x32xf32> to vector<10x32xf32>
    %189 = arith.mulf %187, %188 : vector<10x32xf32>
    %190 = vector.broadcast %13 : vector<1x32xf32> to vector<10x32xf32>
    %191 = arith.addf %189, %190 : vector<10x32xf32>
    %c0_57 = arith.constant 0 : index
    %c0_58 = arith.constant 0 : index
    %c0_59 = arith.constant 0 : index
    %192 = vector.load %arg8[%c0_57, %c0_58, %c0_59] : memref<1x10x32xf32, #tpu.memory_space<vmem>>, vector<1x10x32xf32>
    %193 = vector.shape_cast %192 : vector<1x10x32xf32> to vector<10x32xf32>
    %194 = vector.shape_cast %191 : vector<10x32xf32> to vector<1x10x32xf32>
    tpu.vector_store %arg8[%c0_57, %c0_58, %c0_59], %194 {strides = array<i32>} : memref<1x10x32xf32, #tpu.memory_space<vmem>>, vector<1x10x32xf32>,
    return
  }
  func.func @transform_0(%arg0: i32) -> (i32, i32, i32) {
    %c0_i32 = arith.constant 0 : i32
    %c0_i32_0 = arith.constant 0 : i32
    %c0_i32_1 = arith.constant 0 : i32
    return %arg0, %c0_i32, %c0_i32_0 : i32, i32, i32
  }
  func.func @transform_1(%arg0: i32) -> (i32, i32) {
    %c0_i32 = arith.constant 0 : i32
    %c0_i32_0 = arith.constant 0 : i32
    %c0_i32_1 = arith.constant 0 : i32
    return %c0_i32, %c0_i32_0 : i32, i32
  }
  func.func @transform_2(%arg0: i32) -> (i32, i32) {
    %c0_i32 = arith.constant 0 : i32
    %c0_i32_0 = arith.constant 0 : i32
    %c0_i32_1 = arith.constant 0 : i32
    return %c0_i32, %c0_i32_0 : i32, i32
  }
  func.func @transform_3(%arg0: i32) -> (i32, i32) {
    %c0_i32 = arith.constant 0 : i32
    %c0_i32_0 = arith.constant 0 : i32
    %c0_i32_1 = arith.constant 0 : i32
    return %c0_i32, %c0_i32_0 : i32, i32
  }
  func.func @transform_4(%arg0: i32) -> (i32, i32) {
    %c0_i32 = arith.constant 0 : i32
    %c0_i32_0 = arith.constant 0 : i32
    %c0_i32_1 = arith.constant 0 : i32
    return %c0_i32, %c0_i32_0 : i32, i32
  }
  func.func @transform_5(%arg0: i32) -> (i32, i32) {
    %c0_i32 = arith.constant 0 : i32
    %c0_i32_0 = arith.constant 0 : i32
    %c0_i32_1 = arith.constant 0 : i32
    return %c0_i32, %c0_i32_0 : i32, i32
  }
  func.func @transform_6(%arg0: i32) -> (i32, i32) {
    %c0_i32 = arith.constant 0 : i32
    %c0_i32_0 = arith.constant 0 : i32
    %c0_i32_1 = arith.constant 0 : i32
    return %c0_i32, %c0_i32_0 : i32, i32
  }
  func.func @transform_7(%arg0: i32) -> (i32, i32, i32) {
    %c0_i32 = arith.constant 0 : i32
    %c0_i32_0 = arith.constant 0 : i32
    %c0_i32_1 = arith.constant 0 : i32
    return %arg0, %c0_i32, %c0_i32_0 : i32, i32, i32
  }
}

</mosaic_0001>

<bundles_post_ra>
// kernel: squeeze.2
= control target key start
LH: loop header
LB: loop body
LE: loop exit
PB: predicated region body
PF: predicated region fallthrough
CT: control target
= control target key end

     0   :  { %vm3_vm0 = vcmask 261120   ;;  %s40_s0 = inlined_call_operand.vmem [shape: f32[1,10,32], index: 0, kind: input, shape index: {}]   ;;  %s41_s1 = inlined_call_operand.vmem [shape: f32[2,5,32], index: 1, kind: output, shape index: {}]  }
   0x1   :  { %v2_v0 = vld [vmem:[%s40_s0] sm:$0xff]   ;;  %v13_v1 = vld [vmem:[%s40_s0 + $0x8] sm:$0x3]  }
   0x2   :  { %4 = vst.msk [vmem:[%s41_s1] sm:$0x1f] %vm3_vm0, %v2_v0   ;;  %12 = vst.msk [vmem:[%s41_s1 + $0x3] sm:$0xe0] %vm3_vm0, %v2_v0  }
   0x3   :  { %14 = vst.msk [vmem:[%s41_s1 + $0xb] sm:$0x3] %vm3_vm0, %v13_v1  }

// kernel: _siamese_jit.1
= control target key start
LH: loop header
LB: loop body
LE: loop exit
PB: predicated region body
PF: predicated region fallthrough
CT: control target
= control target key end

     0   :  { %s2016_s24 = smov 0   ;;  %s2337_s0 = inlined_call_operand.vmem [shape: f32[2,8,192], index: 0, kind: input, shape index: {}]   ;;  %s2338_s1 = inlined_call_operand.vmem [shape: f32[192,32], index: 1, kind: input, shape index: {}]   ;;  %s2339_s2 = inlined_call_operand.vmem [shape: f32[32,96], index: 2, kind: input, shape index: {}]   ;;  %s2340_s3 = inlined_call_operand.vmem [shape: f32[32,32], index: 3, kind: input, shape index: {}]   ;;  %s2341_s4 = inlined_call_operand.vmem [shape: f32[32,64], index: 4, kind: input, shape index: {}]   ;;  %s2342_s5 = inlined_call_operand.vmem [shape: f32[64,32], index: 5, kind: input, shape index: {}]   ;;  %s2343_s6 = inlined_call_operand.vmem [shape: f32[17,96], index: 6, kind: input, shape index: {}]   ;;  %s2344_s7 = inlined_call_operand.vmem [shape: f32[2,10,32], index: 7, kind: output, shape index: {}]  }
   0x1 LB: > { %s1659_s25 = sadd.s32 4294967295, %s1965_s24   ;;  %p1663_p0 = scmp.ge.s32.totalorder %s1965_s24, 1  ;;  %s1965_s24 = sphi %s2016_s24, %s17_s24  }
   0x2   : > { %p237_p1 = scmp.lt.s32.totalorder %s1965_s24, 3 }
   0x4   : > { %p238_p2 = pnand %p1663_p0, %p237_p1 }
   0x5   : > { %v284_v0 = vld [vmem:[%s2338_s1] sm:$0xff] (!%p238_p2)  ;;  %v285_v1 = vld [vmem:[%s2338_s1 + $0x8] sm:$0xff] (!%p238_p2)  ;;  %v286_v2 = vld [vmem:[%s2338_s1 + $0x10] sm:$0xff] (!%p238_p2)  ;;  %p269_p3 = scmp.lt.s32.totalorder (!%p238_p2), %s1659_s25, 1  ;;  %v1967_v3 = vmov (!%p238_p2), 0.0|0.0   ;;  %vm312_vm0 = vcmask (!%p238_p2), 523264   ;;  %v308_v39 = vlaneseq (!%p238_p2) }
   0x6   : > { %241 = sbr.rel (%p238_p2) target bundleno = 4692 (0x1254), region = 48  ;;  %1834 = vmatprep.subr.bf16.mxu0 (!%p238_p2), %v1967_v3  ;;  %v1835_v4 = vpack.c.bf16 (!%p238_p2), %v285_v1, %v284_v0  ;;  %v287_v5 = vld [vmem:[%s2338_s1 + $0x18] sm:$0xff] (!%p238_p2)  ;;  %v288_v7 = vld [vmem:[%s2338_s1 + $0x20] sm:$0xff] (!%p238_p2)  ;;  %v289_v8 = vld [vmem:[%s2338_s1 + $0x28] sm:$0xff] (!%p238_p2)  ;;  %vm407_vm1 = vcmask (!%p238_p2), 1040384   ;;  %vm409_vm2 = vcmask (!%p238_p2), 1044480  }
   0x7   : > { %v1838_v6 = vpack.c.bf16 (!%p238_p2), %v287_v5, %v286_v2  ;;  %v1841_v9 = vpack.c.bf16 (!%p238_p2), %v289_v8, %v288_v7  ;;  %v290_v10 = vld [vmem:[%s2338_s1 + $0x30] sm:$0xff] (!%p238_p2)  ;;  %v291_v11 = vld [vmem:[%s2338_s1 + $0x38] sm:$0xff] (!%p238_p2)  ;;  %v292_v14 = vld [vmem:[%s2338_s1 + $0x40] sm:$0xff] (!%p238_p2)  ;;  %v2109_v40 = vshrl.u32 (!%p238_p2), %v308_v39, 7  ;;  %vm411_vm3 = vcmask (!%p238_p2), 1045504   ;;  %s1970_s30 = smov (!%p238_p2), 96  }
   0x8   : > { %1836 = vmatpush1.bf16.msra.mxu0 (!%p238_p2), %v1835_v4  ;;  %v1844_v13 = vpack.c.bf16 (!%p238_p2), %v291_v11, %v290_v10  ;;  %v293_v15 = vld [vmem:[%s2338_s1 + $0x48] sm:$0xff] (!%p238_p2)  ;;  %v294_v17 = vld [vmem:[%s2338_s1 + $0x50] sm:$0xff] (!%p238_p2)  ;;  %v295_v18 = vld [vmem:[%s2338_s1 + $0x58] sm:$0xff] (!%p238_p2)  ;;  %vm413_vm4 = vcmask (!%p238_p2), 261120   ;;  %vm417_vm5 = vcmask (!%p238_p2), 254976   ;;  %vm1969_vm6 = vmmov (!%p238_p2), 0  }
   0x9   : > { %1837 = vmatprep.subr.bf16.mxu0 (!%p238_p2), %v1967_v3  ;;  %v1847_v16 = vpack.c.bf16 (!%p238_p2), %v293_v15, %v292_v14  ;;  %v1850_v19 = vpack.c.bf16 (!%p238_p2), %v295_v18, %v294_v17  ;;  %v296_v20 = vld [vmem:[%s2338_s1 + $0x60] sm:$0xff] (!%p238_p2)  ;;  %v297_v21 = vld [vmem:[%s2338_s1 + $0x68] sm:$0xff] (!%p238_p2)  ;;  %v298_v23 = vld [vmem:[%s2338_s1 + $0x70] sm:$0xff] (!%p238_p2)  ;;  %v310_v41 = vsub.s32 (!%p238_p2), 0, %v2109_v40  ;;  %s1971_s8 = smov (!%p238_p2), 80   ;;  %vm546_vm7 = vcmask (!%p238_p2), 130048  }
   0xa   : > { %v1853_v22 = vpack.c.bf16 (!%p238_p2), %v297_v21, %v296_v20  ;;  %v299_v24 = vld [vmem:[%s2338_s1 + $0x78] sm:$0xff] (!%p238_p2)  ;;  %v300_v26 = vld [vmem:[%s2338_s1 + $0x80] sm:$0xff] (!%p238_p2)  ;;  %v301_v27 = vld [vmem:[%s2338_s1 + $0x88] sm:$0xff] (!%p238_p2)  ;;  %v444_v20 = vsub.s32 (!%p238_p2), 7, %v2109_v40  ;;  %vm622_vm8 = vcmask (!%p238_p2), 36864   ;;  %s1972_s9 = smov (!%p238_p2), 64  }
   0xb   : > { %v1856_v25 = vpack.c.bf16 (!%p238_p2), %v299_v24, %v298_v23  ;;  %v1859_v28 = vpack.c.bf16 (!%p238_p2), %v301_v27, %v300_v26  ;;  %v302_v29 = vld [vmem:[%s2338_s1 + $0x90] sm:$0xff] (!%p238_p2)  ;;  %v303_v30 = vld [vmem:[%s2338_s1 + $0x98] sm:$0xff] (!%p238_p2)  ;;  %v304_v32 = vld [vmem:[%s2338_s1 + $0xa0] sm:$0xff] (!%p238_p2)  ;;  %s1973_s10 = smov (!%p238_p2), 112   ;;  %vm636_vm9 = vcmask (!%p238_p2), 39936   ;;  %s1974_s11 = smov (!%p238_p2), 48  }
   0xc   : > { %1839 = vmatpush1.bf16.msra.mxu0 (!%p238_p2), %v1838_v6  ;;  %v1862_v31 = vpack.c.bf16 (!%p238_p2), %v303_v30, %v302_v29  ;;  %v305_v33 = vld [vmem:[%s2338_s1 + $0xa8] sm:$0xff] (!%p238_p2)  ;;  %v306_v35 = vld [vmem:[%s2338_s1 + $0xb0] sm:$0xff] (!%p238_p2)  ;;  %v307_v36 = vld [vmem:[%s2338_s1 + $0xb8] sm:$0xff] (!%p238_p2)  ;;  %vm885_vm10 = vcmask (!%p238_p2), 1042432   ;;  %s1975_s21 = smov (!%p238_p2), 16  }
   0xd   : > { %s2346_s25 = smov (!%p269_p3, %s1659_s25), 1  ;;  %1840 = vmatprep.subr.bf16.mxu0 %v1967_v3  ;;  %v1865_v34 = vpack.c.bf16 %v305_v33, %v304_v32  ;;  %v1868_v37 = vpack.c.bf16 %v307_v36, %v306_v35  ;;  %v279_v42 = vld [vmem:[%s2343_s6] sm:$0xff]  ;;  %v456_v10 = vld [vmem:[%s2339_s2 + $0x10] sm:$0xff]  ;;  %v2147_v21 = vld [vmem:[%s2343_s6 + $0x8] sm:$0xff]  ;;  %v1968_v32 = vmov 0.0   ;;  %v460_v33 = vsub.s32 1, %v2109_v40 }
   0xe   : > { %s1696_s15 = sshll.u32 %s2346_s25, 4  ;;  %v387_v43 = vrot.slane %v279_v42, 1  ;;  %v311_v44 = vrot.slane %v279_v42, %v310_v41  ;;  %v390_v45 = vrot.slane %v279_v42, 3  ;;  %v393_v46 = vrot.slane %v279_v42, 7  ;;  %v454_v8 = vld [vmem:[%s2339_s2] sm:$0xff] }
   0xf   : > { %s2050_s18 = scalar_lea.vmem %s2337_s0, %s1696_s15 }
  0x10   : > { %v283_v12 = vld [vmem:[%s2050_s18 + $0x8] sm:$0xff]  ;;  %1842 = vmatpush1.bf16.msra.mxu0 %v1841_v9  ;;  %v282_v38 = vld [vmem:[%s2050_s18] sm:$0xff]  ;;  %v389_v47 = vadd.f32 %v387_v43, %v279_v42 }
  0x11   : > { %1668 = vmatprep.mubr.msk.f32.mxu0 %vm312_vm0, %v283_v12  ;;  %1843 = vmatprep.subr.bf16.mxu0 %v1967_v3  ;;  %v455_v9 = vld [vmem:[%s2339_s2 + $0x8] sm:$0xff]  ;;  %v457_v12 = vld [vmem:[%s2339_s2 + $0x18] sm:$0xff] }
  0x12   : > { %v397_v53 = vrot.slane %v389_v47, 1  ;;  %v402_v54 = vrot.slane %v389_v47, 4  ;;  %v1870_v11 = vpack.c.bf16 %v455_v9, %v454_v8 }
  0x14   : > { %1845 = vmatpush1.bf16.msra.mxu0 %v1844_v13  ;;  %v1874_v13 = vpack.c.bf16 %v457_v12, %v456_v10  ;;  %1871 = vmatprep.subr.bf16.mxu1 %v1870_v11 }
  0x15   : > { %1846 = vmatprep.subr.bf16.mxu0 %v1967_v3  ;;  %1873 = vmatpush3.bf16.msra.mxu1 %v1870_v11 }
  0x16   : > { %1875 = vmatprep.subr.bf16.mxu1 %v1874_v13 }
  0x18   : > { %1848 = vmatpush1.bf16.msra.mxu0 %v1847_v16 }
  0x19   : > { %1849 = vmatprep.subr.bf16.mxu0 %v1967_v3  ;;  %1877 = vmatpush3.bf16.msra.mxu1 %v1874_v13 }
  0x1a   : > { %1758 = vmatprep.subr.mxu1 %v1968_v32 }
  0x1c   : > { %1851 = vmatpush1.bf16.msra.mxu0 %v1850_v19 }
  0x1d   : > { %1852 = vmatprep.subr.bf16.mxu0 %v1967_v3 }
  0x20   : > { %1854 = vmatpush1.bf16.msra.mxu0 %v1853_v22  ;;  %v445_v22 = vrot.slane %v279_v42, %v444_v20 }
  0x21   : > { %1855 = vmatprep.subr.bf16.mxu0 %v1967_v3 }
  0x24   : > { %1857 = vmatpush1.bf16.msra.mxu0 %v1856_v25  ;;  %v451_v25 = vrot.slane %v2147_v21, %v310_v41 }
  0x25   : > { %1858 = vmatprep.subr.bf16.mxu0 %v1967_v3 }
  0x28   : > { %1860 = vmatpush1.bf16.msra.mxu0 %v1859_v28 }
  0x29   : > { %1861 = vmatprep.subr.bf16.mxu0 %v1967_v3 }
  0x2c   : > { %1863 = vmatpush1.bf16.msra.mxu0 %v1862_v31 }
  0x2d   : > { %1864 = vmatprep.subr.bf16.mxu0 %v1967_v3 }
  0x30   : > { %1866 = vmatpush1.bf16.msra.mxu0 %v1865_v34  ;;  %v461_v34 = vrot.slane %v2147_v21, %v460_v33 }
  0x31   : > { %1867 = vmatprep.subr.bf16.mxu0 %v1967_v3 }
  0x34   : > { %1869 = vmatpush1.bf16.msra.mxu0 %v1868_v37 }
  0x35   : > { %1753 = vmatprep.subr.mxu0 %v1968_v32 }
  0x37   : > { %381 = vmatmul.mubr.f32.vlgmr.msra.gmra.mrb[0].mxu0 %v282_v38 }
  0x38   : > { %1755 = vmatprep.mubr.msk.f32.mxu0 %vm1969_vm6, %v1968_v32 }
 0x10a   : > { %v382_v48 = vpop.f32.mrb[0].mxu0 }
 0x10b   : > { %v383_v49 = vadd.f32 %v382_v48, %v311_v44  ;;  %v384_v50 = vpop.f32.mrb[1].mxu0 }
 0x10d   : > { %v392_v51 = vadd.f32 %v390_v45, %v383_v49  ;;  %v395_v52 = vadd.f32 %v393_v46, %v383_v49 }
 0x10f   : > { %v400_v55 = vrot.slane %v392_v51, 7  ;;  %v2117_v56 = vrot.slane %v395_v52, 6 }
 0x111   : > { %v408_v57 = vsel %vm407_vm1, %v397_v53, %v400_v55  ;;  %v418_v61 = vsel %vm417_vm5, %v2117_v56, 0.0 }
 0x112   : > { %v410_v58 = vsel %vm409_vm2, %v408_v57, %v402_v54 }
 0x113   : > { %v2121_v59 = vsel %vm411_vm3, %v410_v58, %v2117_v56 }
 0x114   : > { %v414_v60 = vsel %vm413_vm4, %v2121_v59, 0.0 }
 0x115   : > { %415 = vadd.xlane.f32.xlu0 %v414_v60 }
 0x119   : > { %419 = vadd.xlane.f32.xlu0 %v418_v61 }
 0x1a2   : > { %v416_v62 = vpop.xlane.xlu0 %415 }
 0x1a3   : > { %v422_v63 = vmul.f32 0.03125, %v416_v62 }
 0x1a5   : > { %v424_v0 = vsub.f32 %v2121_v59, %v422_v63 }
 0x1a6   : > { %v420_v1 = vpop.xlane.xlu0 %419 }
 0x1a7   : > { %v423_v2 = vmul.f32 0.03125, %v420_v1  ;;  %v426_v3 = vmul.f32 %v424_v0, %v424_v0 }
 0x1a9   : > { %v425_v4 = vsub.f32 %v2117_v56, %v423_v2  ;;  %v428_v5 = vsel %vm413_vm4, %v426_v3, 0.0 }
 0x1aa   : > { %429 = vadd.xlane.f32.xlu1 %v428_v5 }
 0x1ab   : > { %v427_v6 = vmul.f32 %v425_v4, %v425_v4 }
 0x1ad   : > { %v431_v7 = vsel %vm417_vm5, %v427_v6, 0.0 }
 0x1ae   : > { %432 = vadd.xlane.f32.xlu1 %v431_v7 }
 0x237   : > { %v430_v14 = vpop.xlane.xlu1 %429 }
 0x238   : > { %v434_v15 = vmul.f32 0.03125, %v430_v14 }
 0x23a   : > { %v436_v16 = vadd.f32 1e-12, %v434_v15 }
 0x23b   : > { %v433_v17 = vpop.xlane.xlu1 %432 }
 0x23c   : > { %1927 = vrsqrt.f32 %v436_v16  ;;  %v435_v18 = vmul.f32 0.03125, %v433_v17 }
 0x23e   : > { %v437_v19 = vadd.f32 1e-12, %v435_v18 }
 0x240   : > { %1929 = vrsqrt.f32 %v437_v19 }
 0x246   : > { %v1928_v23 = vpop.eup %1927 }
 0x247   : > { %v440_v24 = vmul.f32 %v1928_v23, %v424_v0 }
 0x249   : > { %v446_v26 = vmul.f32 %v445_v22, %v440_v24 }
 0x24a   : > { %v1930_v27 = vpop.eup %1929 }
 0x24b   : > { %v441_v28 = vmul.f32 %v1930_v27, %v425_v4  ;;  %v452_v29 = vadd.f32 %v451_v25, %v446_v26 }
 0x24d   : > { %v447_v30 = vmul.f32 %v445_v22, %v441_v28  ;;  %1750 = vmatprep.mubr.msk.f32.mxu1 %vm413_vm4, %v452_v29 }
 0x24f   : > { %v453_v31 = vadd.f32 %v451_v25, %v447_v30 }
 0x251   : > { %1751 = vmatmul.mubr.msk.f32.vlgmr.msra.gmra.mrb[0].mxu1 %vm413_vm4, %v453_v31 }
 0x252   : > { %1760 = vmatprep.mubr.msk.f32.mxu1 %vm1969_vm6, %v1968_v32 }
 0x324   : > { %v1752_v35 = vpop.f32.mrb[0].mxu1 }
 0x325   : > { %v2164_v36 = vadd.f32 %v1752_v35, %v461_v34  ;;  %v534_v37 = vpop.f32.mrb[1].mxu1 }
 0x326   : > { %v2166_v38 = vadd.f32 %v534_v37, %v461_v34 }
 0x327   : > { %v887_v6 = vrot.slane %v2164_v36, 5 }
 0x328   : > { %544 = vrot.lane.b32.xlu0 %v2166_v38, %s1970_s30  ;;  %v886_v7 = vrot.slane %v2166_v38, 5 }
 0x32a   : > { %v888_v8 = vsel %vm885_vm10, %v886_v7, %v887_v6 }
 0x32c   : > { %714 = vrot.lane.b32.xlu0 %v2166_v38, %s1971_s8 }
 0x39a   : > { %v545_v39 = vpop.permute.xlu0 %544 }
 0x39b   : > { %1754 = vmatpush3.xpose.msk.msra.mxu0 %vm546_vm7, %v545_v39 }
 0x39e   : > { %1756 = vmatmul.mubr.msk.f32.vlgmr.msra.gmra.mrb[2].mxu0 %vm546_vm7, %v2166_v38  ;;  %v715_v54 = vpop.permute.xlu0 %714 }
 0x471   : > { %v617_v41 = vpop.f32.mrb[2].mxu0 }
 0x472   : > { %v621_v42 = vmul.f32 0.25, %v617_v41  ;;  %v1757_v43 = vpop.f32.mrb[3].mxu0 }
 0x474   : > { %v623_v44 = vsel %vm622_vm8, %v621_v42, -inf }
 0x475   : > { %624 = vmax.xlane.f32.xlu1 %v623_v44 }
 0x486   : > { %634 = vrot.lane.b32.xlu1 %v2166_v38, %s1972_s9 }
 0x502   : > { %v625_v45 = vpop.xlane.xlu1 %624 }
 0x503   : > { %v626_v46 = vsub.f32 %v621_v42, %v625_v45 }
 0x505   : > { %v627_v47 = vmul.f32 1.442695, %v626_v46 }
 0x506   : > { %v635_v48 = vpop.permute.xlu1 %634 }
 0x507   : > { %1931 = vpow2.f32 %v627_v47  ;;  %1759 = vmatpush3.msk.msra.mxu1 %vm409_vm2, %v635_v48  ;;  %v1230_v48 = vld [vmem:[%s2340_s3] sm:$0xff] }
 0x508   : > { %1763 = vmatprep.subr.mxu1 %v1968_v32 }
 0x511   : > { %v1932_v49 = vpop.eup %1931 }
 0x512   : > { %v629_v50 = vsel %vm622_vm8, %v1932_v49, 0.0 }
 0x513   : > { %630 = vadd.xlane.f32.xlu1 %v629_v50 }
 0x524   : > { %712 = vrot.lane.b32.xlu1 %v2166_v38, %s1973_s10 }
 0x5a0   : > { %v631_v51 = vpop.xlane.xlu1 %630 }
 0x5a1   : > { %1933 = vrcp.f32 %v631_v51  ;;  %v1232_v51 = vld [vmem:[%s2340_s3 + $0x10] sm:$0xff] }
 0x5a4   : > { %v713_v55 = vpop.permute.xlu1 %712 }
 0x5ab   : > { %v1934_v52 = vpop.eup %1933 }
 0x5ac   : > { %v633_v53 = vmul.f32 %v1934_v52, %v1932_v49  ;;  %v1231_v49 = vld [vmem:[%s2340_s3 + $0x8] sm:$0xff]  ;;  %v1233_v52 = vld [vmem:[%s2340_s3 + $0x18] sm:$0xff] }
 0x5ad   : > { %v1878_v50 = vpack.c.bf16 %v1231_v49, %v1230_v48  ;;  %v1469_v48 = vld [vmem:[%s2342_s5 + $0x10] sm:$0xff]  ;;  %v1470_v49 = vld [vmem:[%s2342_s5 + $0x18] sm:$0xff] }
 0x5ae   : > { %1761 = vmatmul.mubr.msk.f32.vlgmr.msra.gmra.mrb[2].mxu1 %vm636_vm9, %v633_v53  ;;  %v1882_v53 = vpack.c.bf16 %v1233_v52, %v1232_v51  ;;  %v1471_v51 = vld [vmem:[%s2342_s5 + $0x20] sm:$0xff]  ;;  %v1472_v52 = vld [vmem:[%s2342_s5 + $0x28] sm:$0xff] }
 0x5af   : > { %1764 = vmatpush3.xpose.msk.msra.mxu1 %vm546_vm7, %v715_v54  ;;  %1765 = vmatprep.mubr.msk.f32.mxu1 %vm1969_vm6, %v1968_v32 }
 0x5b0   : > { %1768 = vmatprep.subr.mxu1 %v1968_v32 }
 0x5b2   : > { %1766 = vmatmul.mubr.msk.f32.vlgmr.msra.gmra.mrb[4].mxu1 %vm546_vm7, %v713_v55 }
 0x5b3   : > { %1770 = vmatprep.mubr.msk.f32.mxu1 %vm1969_vm6, %v1968_v32 }
 0x681   : > { %v2191_v57 = vpop.f32.mrb[2].mxu1 }
 0x682   : > { %v1762_v58 = vpop.f32.mrb[3].mxu1 }
 0x685   : > { %v786_v60 = vpop.f32.mrb[4].mxu1 }
 0x686   : > { %v790_v61 = vmul.f32 0.25, %v786_v60  ;;  %v1767_v62 = vpop.f32.mrb[5].mxu1 }
 0x688   : > { %v791_v63 = vsel %vm622_vm8, %v790_v61, -inf }
 0x689   : > { %792 = vmax.xlane.f32.xlu0 %v791_v63 }
 0x69f   : > { %802 = vrot.lane.b32.xlu0 %v2166_v38, %s1974_s11 }
 0x716   : > { %v793_v0 = vpop.xlane.xlu0 %792 }
 0x717   : > { %v794_v1 = vsub.f32 %v790_v61, %v793_v0 }
 0x719   : > { %v795_v2 = vmul.f32 1.442695, %v794_v1  ;;  %v1318_v1 = vsub.s32 2, %v2109_v40 }
 0x71a   : > { %v803_v3 = vpop.permute.xlu0 %802 }
 0x71b   : > { %1935 = vpow2.f32 %v795_v2  ;;  %1769 = vmatpush3.msk.msra.mxu1 %vm409_vm2, %v803_v3  ;;  %v1319_v2 = vrot.slane %v2147_v21, %v1318_v1 }
 0x71c   : > { %1773 = vmatprep.subr.mxu1 %v1968_v32 }
 0x725   : > { %v1936_v4 = vpop.eup %1935 }
 0x726   : > { %v797_v5 = vsel %vm622_vm8, %v1936_v4, 0.0 }
 0x727   : > { %798 = vadd.xlane.f32.xlu1 %v797_v5 }
 0x738   : > { %889 = vrot.lane.b32.xlu1 %v888_v8, %s1970_s30 }
 0x7b4   : > { %v799_v9 = vpop.xlane.xlu1 %798 }
 0x7b5   : > { %1937 = vrcp.f32 %v799_v9 }
 0x7b8   : > { %v890_v12 = vpop.permute.xlu1 %889 }
 0x7bf   : > { %v1938_v10 = vpop.eup %1937 }
 0x7c0   : > { %v801_v11 = vmul.f32 %v1938_v10, %v1936_v4 }
 0x7c2   : > { %1771 = vmatmul.mubr.msk.f32.vlgmr.msra.gmra.mrb[6].mxu1 %vm636_vm9, %v801_v11 }
 0x7c3   : > { %1774 = vmatpush3.xpose.msk.msra.mxu1 %vm546_vm7, %v890_v12  ;;  %1775 = vmatprep.mubr.msk.f32.mxu1 %vm1969_vm6, %v1968_v32 }
 0x7c4   : > { %1778 = vmatprep.subr.mxu1 %v1968_v32 }
 0x7c6   : > { %1776 = vmatmul.mubr.msk.f32.vlgmr.msra.gmra.mrb[8].mxu1 %vm546_vm7, %v888_v8 }
 0x7c7   : > { %1780 = vmatprep.mubr.msk.f32.mxu1 %vm1969_vm6, %v1968_v32 }
 0x895   : > { %v2210_v13 = vpop.f32.mrb[6].mxu1 }
 0x896   : > { %v1772_v14 = vpop.f32.mrb[7].mxu1 }
 0x899   : > { %v961_v15 = vpop.f32.mrb[8].mxu1 }
 0x89a   : > { %v965_v16 = vmul.f32 0.25, %v961_v15  ;;  %v1777_v17 = vpop.f32.mrb[9].mxu1 }
 0x89c   : > { %v966_v18 = vsel %vm622_vm8, %v965_v16, -inf }
 0x89d   : > { %967 = vmax.xlane.f32.xlu0 %v966_v18  ;;  %v1360_v18 = vld [vmem:[%s2341_s4] sm:$0xff] }
 0x8b3   : > { %977 = vrot.lane.b32.xlu0 %v888_v8, %s1972_s9  ;;  %s278_s9 = scalar_lea.vmem %s2344_s7, %s1696_s15 }
 0x8b7   : > { %1054 = vrot.lane.b32.xlu0 %v888_v8, %s1973_s10 }
 0x92a   : > { %v968_v19 = vpop.xlane.xlu0 %967 }
 0x92b   : > { %v969_v22 = vsub.f32 %v965_v16, %v968_v19  ;;  %v1361_v19 = vld [vmem:[%s2341_s4 + $0x8] sm:$0xff] }
 0x92d   : > { %v970_v23 = vmul.f32 1.442695, %v969_v22  ;;  %v1886_v22 = vpack.c.bf16 %v1361_v19, %v1360_v18  ;;  %v1560_v19 = vsub.s32 6, %v2109_v40 }
 0x92e   : > { %v978_v24 = vpop.permute.xlu0 %977 }
 0x92f   : > { %1939 = vpow2.f32 %v970_v23  ;;  %1779 = vmatpush3.msk.msra.mxu1 %vm409_vm2, %v978_v24  ;;  %1887 = vmatprep.subr.bf16.mxu0 %v1886_v22  ;;  %v1362_v23 = vld [vmem:[%s2341_s4 + $0x10] sm:$0xff]  ;;  %v1363_v24 = vld [vmem:[%s2341_s4 + $0x18] sm:$0xff] }
 0x930   : > { %1783 = vmatprep.subr.mxu1 %v1968_v32  ;;  %1889 = vmatpush3.bf16.msra.mxu0 %v1886_v22  ;;  %v1561_v22 = vrot.slane %v2147_v21, %v1560_v19 }
 0x932   : > { %v1055_v31 = vpop.permute.xlu0 %1054 }
 0x939   : > { %v1940_v25 = vpop.eup %1939 }
 0x93a   : > { %v972_v26 = vsel %vm622_vm8, %v1940_v25, 0.0 }
 0x93b   : > { %973 = vadd.xlane.f32.xlu1 %v972_v26 }
 0x94c   : > { %1056 = vrot.lane.b32.xlu1 %v888_v8, %s1971_s8 }
 0x9c8   : > { %v974_v27 = vpop.xlane.xlu1 %973 }
 0x9c9   : > { %1941 = vrcp.f32 %v974_v27 }
 0x9cc   : > { %v1057_v30 = vpop.permute.xlu1 %1056 }
 0x9d3   : > { %v1942_v28 = vpop.eup %1941 }
 0x9d4   : > { %v976_v29 = vmul.f32 %v1942_v28, %v1940_v25  ;;  %v1890_v25 = vpack.c.bf16 %v1363_v24, %v1362_v23 }
 0x9d6   : > { %1781 = vmatmul.mubr.msk.f32.vlgmr.msra.gmra.mrb[10].mxu1 %vm636_vm9, %v976_v29  ;;  %1891 = vmatprep.subr.bf16.mxu0 %v1890_v25 }
 0x9d7   : > { %1784 = vmatpush3.xpose.msk.msra.mxu1 %vm546_vm7, %v1057_v30  ;;  %1785 = vmatprep.mubr.msk.f32.mxu1 %vm1969_vm6, %v1968_v32 }
 0x9d8   : > { %1788 = vmatprep.subr.mxu1 %v1968_v32  ;;  %1893 = vmatpush3.bf16.msra.mxu0 %v1890_v25 }
 0x9da   : > { %1786 = vmatmul.mubr.msk.f32.vlgmr.msra.gmra.mrb[12].mxu1 %vm546_vm7, %v1055_v31 }
 0x9db   : > { %1790 = vmatprep.mubr.msk.f32.mxu1 %vm1969_vm6, %v1968_v32 }
 0xaa9   : > { %v1050_v33 = vpop.f32.mrb[10].mxu1 }
 0xaaa   : > { %v1782_v34 = vpop.f32.mrb[11].mxu1 }
 0xaab   : > { %v1356_v34 = vsub.s32 4, %v2109_v40 }
 0xaad   : > { %v1128_v35 = vpop.f32.mrb[12].mxu1 }
 0xaae   : > { %v1132_v36 = vmul.f32 0.25, %v1128_v35  ;;  %v1787_v37 = vpop.f32.mrb[13].mxu1 }
 0xab0   : > { %v1133_v38 = vsel %vm622_vm8, %v1132_v36, -inf }
 0xab1   : > { %1134 = vmax.xlane.f32.xlu1 %v1133_v38  ;;  %v1357_v38 = vrot.slane %v2147_v21, %v1356_v34 }
 0xb3e   : > { %v1135_v39 = vpop.xlane.xlu1 %1134 }
 0xb3f   : > { %v1136_v41 = vsub.f32 %v1132_v36, %v1135_v39 }
 0xb41   : > { %v1137_v42 = vmul.f32 1.442695, %v1136_v41 }
 0xb43   : > { %1943 = vpow2.f32 %v1137_v42 }
 0xb4d   : > { %v1944_v43 = vpop.eup %1943 }
 0xb4e   : > { %v1139_v44 = vsel %vm622_vm8, %v1944_v43, 0.0 }
 0xb4f   : > { %1140 = vadd.xlane.f32.xlu0 %v1139_v44 }
 0xb65   : > { %1144 = vrot.lane.b32.xlu0 %v888_v8, %s1974_s11 }
 0xbdc   : > { %v1141_v45 = vpop.xlane.xlu0 %1140 }
 0xbdd   : > { %1945 = vrcp.f32 %v1141_v45 }
 0xbe0   : > { %v1145_v32 = vpop.permute.xlu0 %1144 }
 0xbe1   : > { %1789 = vmatpush3.msk.msra.mxu1 %vm409_vm2, %v1145_v32  ;;  %v1467_v32 = vld [vmem:[%s2342_s5] sm:$0xff] }
 0xbe2   : > { %1879 = vmatprep.subr.bf16.mxu1 %v1878_v50 }
 0xbe7   : > { %v1946_v46 = vpop.eup %1945 }
 0xbe8   : > { %v1143_v47 = vmul.f32 %v1946_v46, %v1944_v43  ;;  %v1468_v46 = vld [vmem:[%s2342_s5 + $0x8] sm:$0xff] }
 0xbea   : > { %1791 = vmatmul.mubr.msk.f32.vlgmr.msra.gmra.mrb[14].mxu1 %vm636_vm9, %v1143_v47  ;;  %v1894_v47 = vpack.c.bf16 %v1468_v46, %v1467_v32  ;;  %v1593_v46 = vrot.slane %v2147_v21, %v444_v20 }
 0xbeb   : > { %1881 = vmatpush3.bf16.msra.mxu1 %v1878_v50  ;;  %v1898_v50 = vpack.c.bf16 %v1470_v49, %v1469_v48 }
 0xbec   : > { %1883 = vmatprep.subr.bf16.mxu1 %v1882_v53 }
 0xbef   : > { %1885 = vmatpush3.bf16.msra.mxu1 %v1882_v53  ;;  %v1902_v53 = vpack.c.bf16 %v1472_v52, %v1471_v51 }
 0xbf0   : > { %1895 = vmatprep.subr.bf16.mxu1 %v1894_v47 }
 0xcbd   : > { %v1217_v54 = vpop.f32.mrb[14].mxu1 }
 0xcbe   : > { %1222 = vrot.lane.b32.xlu1 %v1217_v54, %s1975_s21  ;;  %v1792_v55 = vpop.f32.mrb[15].mxu1  ;;  %v1473_v54 = vld [vmem:[%s2342_s5 + $0x30] sm:$0xff] }
 0xcbf   : > { %v1474_v55 = vld [vmem:[%s2342_s5 + $0x38] sm:$0xff] }
 0xcc2   : > { %880 = vrot.lane.b32.xlu1 %v2210_v13, %s1975_s21 }
 0xd30   : > { %v1223_v58 = vpop.permute.xlu1 %1222 }
 0xd31   : > { %v1225_v60 = vsel %vm546_vm7, %v1050_v33, %v1223_v58  ;;  %v1350_v33 = vsub.s32 3, %v2109_v40  ;;  %v1906_v58 = vpack.c.bf16 %v1474_v55, %v1473_v54 }
 0xd32   : > { %v1227_v61 = vrot.slane %v1225_v60, 3  ;;  %v1366_v60 = vsub.s32 5, %v2109_v40 }
 0xd33   : > { %v1351_v35 = vrot.slane %v2147_v21, %v1350_v33 }
 0xd34   : > { %v881_v62 = vpop.permute.xlu1 %880 }
 0xd35   : > { %v883_v63 = vsel %vm546_vm7, %v2191_v57, %v881_v62 }
 0xd36   : > { %v1229_v0 = vsel %vm409_vm2, %v883_v63, %v1227_v61 }
 0xd37   : > { %1801 = vmatprep.mubr.msk.f32.mxu1 %vm413_vm4, %v1229_v0 }
 0xd38   : > { %1802 = vmatmul.mubr.msk.f32.vlgmr.msra.gmra.mrb[16].mxu1 %vm413_vm4, %v1227_v61  ;;  %v1367_v61 = vrot.slane %v2147_v21, %v1366_v60 }
 0xd39   : > { %1897 = vmatpush3.bf16.msra.mxu1 %v1894_v47 }
 0xd3a   : > { %1899 = vmatprep.subr.bf16.mxu1 %v1898_v50 }
 0xd3d   : > { %1901 = vmatpush3.bf16.msra.mxu1 %v1898_v50  ;;  %v1693_v50 = vld [vmem:[%s2343_s6 + $0x10] ss:$0 sm:$0xff] }
 0xd3e   : > { %1903 = vmatprep.subr.bf16.mxu1 %v1902_v53 }
 0xd41   : > { %1905 = vmatpush3.bf16.msra.mxu1 %v1902_v53 }
 0xd42   : > { %1907 = vmatprep.subr.bf16.mxu1 %v1906_v58 }
 0xd45   : > { %1909 = vmatpush3.bf16.msra.mxu1 %v1906_v58 }
 0xe0b   : > { %v1803_v3 = vpop.f32.mrb[16].mxu1 }
 0xe0c   : > { %v1315_v4 = vadd.f32 %v1803_v3, %v2117_v56  ;;  %v1305_v5 = vpop.f32.mrb[17].mxu1 }
 0xe0d   : > { %v1314_v6 = vadd.f32 %v1305_v5, %v2121_v59 }
 0xe0e   : > { %v2255_v7 = vadd.f32 %v1319_v2, %v1315_v4 }
 0xe0f   : > { %v2257_v8 = vadd.f32 %v1319_v2, %v1314_v6 }
 0xe10   : > { %v1325_v57 = vsel %vm417_vm5, %v2255_v7, 0.0 }
 0xe11   : > { %1326 = vadd.xlane.f32.xlu1 %v1325_v57  ;;  %v1322_v9 = vsel %vm413_vm4, %v2257_v8, 0.0 }
 0xe12   : > { %1323 = vadd.xlane.f32.xlu0 %v1322_v9 }
 0xe9e   : > { %v1327_v10 = vpop.xlane.xlu1 %1326 }
 0xe9f   : > { %v1329_v11 = vmul.f32 0.03125, %v1327_v10  ;;  %v1324_v12 = vpop.xlane.xlu0 %1323 }
 0xea0   : > { %v1328_v13 = vmul.f32 0.03125, %v1324_v12 }
 0xea1   : > { %v1331_v56 = vsub.f32 %v2255_v7, %v1329_v11 }
 0xea2   : > { %v1330_v59 = vsub.f32 %v2257_v8, %v1328_v13 }
 0xea3   : > { %v1333_v16 = vmul.f32 %v1331_v56, %v1331_v56 }
 0xea4   : > { %v1332_v14 = vmul.f32 %v1330_v59, %v1330_v59 }
 0xea5   : > { %v1337_v17 = vsel %vm417_vm5, %v1333_v16, 0.0 }
 0xea6   : > { %v1334_v15 = vsel %vm413_vm4, %v1332_v14, 0.0 }
 0xea7   : > { %1335 = vadd.xlane.f32.xlu0 %v1334_v15 }
 0xeab   : > { %1338 = vadd.xlane.f32.xlu0 %v1337_v17 }
 0xf34   : > { %v1336_v26 = vpop.xlane.xlu0 %1335 }
 0xf35   : > { %v1340_v27 = vmul.f32 0.03125, %v1336_v26 }
 0xf37   : > { %v1342_v28 = vadd.f32 1e-12, %v1340_v27 }
 0xf38   : > { %v1339_v29 = vpop.xlane.xlu0 %1338 }
 0xf39   : > { %1947 = vrsqrt.f32 %v1342_v28  ;;  %v1341_v30 = vmul.f32 0.03125, %v1339_v29 }
 0xf3b   : > { %v1343_v31 = vadd.f32 1e-12, %v1341_v30 }
 0xf3d   : > { %1949 = vrsqrt.f32 %v1343_v31 }
 0xf43   : > { %v1948_v36 = vpop.eup %1947 }
 0xf44   : > { %v1346_v37 = vmul.f32 %v1948_v36, %v1330_v59 }
 0xf46   : > { %v1352_v39 = vmul.f32 %v1351_v35, %v1346_v37 }
 0xf47   : > { %v1950_v41 = vpop.eup %1949 }
 0xf48   : > { %v1347_v42 = vmul.f32 %v1950_v41, %v1331_v56  ;;  %v1358_v43 = vadd.f32 %v1357_v38, %v1352_v39 }
 0xf4a   : > { %v1353_v44 = vmul.f32 %v1351_v35, %v1347_v42  ;;  %1812 = vmatprep.mubr.msk.f32.mxu0 %vm413_vm4, %v1358_v43 }
 0xf4c   : > { %v1359_v45 = vadd.f32 %v1357_v38, %v1353_v44 }
 0xf4e   : > { %1813 = vmatmul.mubr.msk.f32.vlgmr.msra.gmra.mrb[4].mxu0 %vm413_vm4, %v1359_v45 }
0x1021   : > { %v1814_v62 = vpop.f32.mrb[4].mxu0 }
0x1022   : > { %v1446_v63 = vadd.f32 %v1814_v62, %v1367_v61  ;;  %v1440_v0 = vpop.f32.mrb[5].mxu0 }
0x1023   : > { %v1441_v1 = vadd.f32 %v1440_v0, %v1367_v61 }
0x1024   : > { %v1450_v2 = vmul.f32 %v1446_v63, %v1446_v63 }
0x1025   : > { %v1449_v3 = vmul.f32 %v1441_v1, %v1441_v1 }
0x1026   : > { %v1452_v4 = vmul.f32 %v1450_v2, %v1446_v63 }
0x1027   : > { %v1451_v5 = vmul.f32 %v1449_v3, %v1441_v1 }
0x1028   : > { %v1454_v6 = vmul.f32 0.044715, %v1452_v4 }
0x1029   : > { %v1453_v57 = vmul.f32 0.044715, %v1451_v5 }
0x102a   : > { %v1456_v9 = vadd.f32 %v1454_v6, %v1446_v63 }
0x102b   : > { %v1455_v10 = vadd.f32 %v1453_v57, %v1441_v1 }
0x102c   : > { %v1458_v11 = vmul.f32 0.7978846, %v1456_v9 }
0x102d   : > { %v1457_v12 = vmul.f32 0.7978846, %v1455_v10 }
0x102e   : > { %1951 = vtanh.f32 %v1458_v11 }
0x102f   : > { %1953 = vtanh.f32 %v1457_v12 }
0x1038   : > { %v1952_v13 = vpop.eup %1951 }
0x1039   : > { %v1954_v56 = vpop.eup %1953  ;;  %v1462_v59 = vadd.f32 1.0, %v1952_v13 }
0x103a   : > { %v1461_v14 = vadd.f32 1.0, %v1954_v56 }
0x103b   : > { %v1464_v15 = vmul.f32 0.5, %v1462_v59 }
0x103c   : > { %v1463_v16 = vmul.f32 0.5, %v1461_v14 }
0x103d   : > { %v1466_v18 = vmul.f32 %v1464_v15, %v1446_v63 }
0x103e   : > { %v1465_v17 = vmul.f32 %v1463_v16, %v1441_v1 }
0x1040   : > { %1831 = vmatprep.mubr.msk.f32.mxu1 %vm312_vm0, %v1465_v17 }
0x1041   : > { %1832 = vmatmul.mubr.msk.f32.vlgmr.msra.gmra.mrb[18].mxu1 %vm312_vm0, %v1466_v18 }
0x1114   : > { %v1833_v23 = vpop.f32.mrb[18].mxu1 }
0x1115   : > { %v1557_v24 = vadd.f32 %v1833_v23, %v2255_v7  ;;  %v1547_v25 = vpop.f32.mrb[19].mxu1 }
0x1116   : > { %v1556_v26 = vadd.f32 %v1547_v25, %v2257_v8 }
0x1117   : > { %v1563_v27 = vadd.f32 %v1561_v22, %v1557_v24 }
0x1118   : > { %v1562_v28 = vadd.f32 %v1561_v22, %v1556_v26 }
0x1119   : > { %v1567_v29 = vsel %vm417_vm5, %v1563_v27, 0.0 }
0x111a   : > { %1568 = vadd.xlane.f32.xlu1 %v1567_v29  ;;  %v1564_v30 = vsel %vm413_vm4, %v1562_v28, 0.0 }
0x111b   : > { %1565 = vadd.xlane.f32.xlu0 %v1564_v30 }
0x11a7   : > { %v1569_v31 = vpop.xlane.xlu1 %1568 }
0x11a8   : > { %v1571_v33 = vmul.f32 0.03125, %v1569_v31  ;;  %v1566_v34 = vpop.xlane.xlu0 %1565 }
0x11a9   : > { %v1570_v35 = vmul.f32 0.03125, %v1566_v34 }
0x11aa   : > { %v1573_v36 = vsub.f32 %v1563_v27, %v1571_v33 }
0x11ab   : > { %v1572_v37 = vsub.f32 %v1562_v28, %v1570_v35 }
0x11ac   : > { %v1575_v38 = vmul.f32 %v1573_v36, %v1573_v36 }
0x11ad   : > { %v1574_v39 = vmul.f32 %v1572_v37, %v1572_v37 }
0x11ae   : > { %v1579_v7 = vsel %vm417_vm5, %v1575_v38, 0.0 }
0x11af   : > { %1580 = vadd.xlane.f32.xlu1 %v1579_v7  ;;  %v1576_v8 = vsel %vm413_vm4, %v1574_v39, 0.0 }
0x11b0   : > { %1577 = vadd.xlane.f32.xlu0 %v1576_v8 }
0x123c   : > { %v1581_v41 = vpop.xlane.xlu1 %1580 }
0x123d   : > { %v1583_v42 = vmul.f32 0.03125, %v1581_v41  ;;  %v1578_v43 = vpop.xlane.xlu0 %1577 }
0x123e   : > { %v1582_v44 = vmul.f32 0.03125, %v1578_v43 }
0x123f   : > { %v1585_v45 = vadd.f32 1e-12, %v1583_v42 }
0x1240   : > { %v1584_v32 = vadd.f32 1e-12, %v1582_v44 }
0x1241   : > { %1955 = vrsqrt.f32 %v1585_v45 }
0x1242   : > { %1957 = vrsqrt.f32 %v1584_v32 }
0x124b   : > { %v1956_v47 = vpop.eup %1955 }
0x124c   : > { %v1958_v48 = vpop.eup %1957  ;;  %v1589_v49 = vmul.f32 %v1956_v47, %v1573_v36 }
0x124d   : > { %v1588_v51 = vmul.f32 %v1958_v48, %v1572_v37 }
0x124e   : > { %v1595_v52 = vmul.f32 %v1593_v46, %v1589_v49 }
0x124f   : > { %v1594_v53 = vmul.f32 %v1593_v46, %v1588_v51 }
0x1250   : > { %v1601_v54 = vadd.f32 %v1693_v50, %v1595_v52 }
0x1251   : > { %v1600_v55 = vadd.f32 %v1693_v50, %v1594_v53 }
0x1252   : > { %1603 = vst.msk [vmem:[%s278_s9 + $0x8] sm:$0x3] %vm417_vm5, %v1601_v54 }
0x1253   : > { %1602 = vst.msk [vmem:[%s278_s9] sm:$0xff] %vm413_vm4, %v1600_v55 }
0x1254 PF: > { %s17_s24 = sadd.s32 1, %s1965_s24  }
0x1255   : > { %p14_p4 = scmp.ge.s32.totalorder %s17_s24, 4  }
0x1257   :  { %16 = sbr.rel (!%p14_p4) target bundleno = 1 (0x1), region = 78 }

</bundles_post_ra>
